<compile_context>
chip_gen: v6e
topology: v6e:2x2x1
jax: 0.10.0
libtpu: 0.0.40
codegen_flags: <defaults>
</compile_context>

<pallas_src>
import functools

import jax
import jax.numpy as jnp
from jax.experimental import pallas as pl
from jax.experimental.pallas import tpu as pltpu


def layernorm_kernel(x_ref, w_ref, b_ref, o_ref, *, eps, hidden, hidden_padded,
                     native_apply):
    # x_ref: (TR, Hp) tile; w_ref/b_ref: (1, Hp). Columns >= hidden are zero
    # padding added by the wrapper (gamma/beta are zero-padded as well).
    x = x_ref[...]
    xf = x.astype(jnp.float32)
    inv_h = jnp.float32(1.0 / hidden)

    # Mean: padded columns hold zeros, so the full-row sum equals the sum over
    # the real columns; divide by the true hidden size.
    u = jnp.sum(xf, axis=-1, keepdims=True) * inv_h

    d = xf - u
    if hidden_padded != hidden:
        # Mask padded columns out of the variance (they would contribute u^2).
        col = jax.lax.broadcasted_iota(jnp.int32, d.shape, 1)
        d = jnp.where(col < hidden, d, jnp.float32(0.0))
    var = jnp.sum(d * d, axis=-1, keepdims=True) * inv_h        # biased variance
    inv = jax.lax.rsqrt(var + jnp.float32(eps))                 # eps inside sqrt

    if native_apply:
        # bf16 affine path (v6e/v7x bf16 VALUs): stats stay in f32, only the
        # per-element apply runs in the input dtype. Padded output columns end
        # up as 0 * anything + 0 and are sliced away by the wrapper.
        cd = x.dtype
        y = (x - u.astype(cd)) * inv.astype(cd)
        out = w_ref[...].astype(cd) * y + b_ref[...].astype(cd)
    else:
        y = d * inv
        out = w_ref[...].astype(jnp.float32) * y + b_ref[...].astype(jnp.float32)
    o_ref[...] = out.astype(o_ref.dtype)


def _vmem_budget_and_limit():
    """Generation-aware (working-set budget, scoped vmem_limit_bytes)."""
    mib = 1024 * 1024
    cap = None
    try:
        cap = int(pltpu.get_tpu_info().vmem_capacity_bytes)
    except Exception:  # info unavailable -> conservative defaults, safe everywhere
        cap = None
    if cap is None:
        return 32 * mib, 48 * mib
    if cap <= 64 * mib:                 # v7x: 64 MiB per TensorCore
        return 36 * mib, 48 * mib
    return 72 * mib, 96 * mib           # v5e/v6e (128 MiB): keep the tile big


def _pick_row_tile(R, Hp, in_dtype, out_dtype, vmem_budget_bytes):
    """Largest /8-aligned row tile whose pipeline working set fits the budget.

    Budget accounting (per row of the tile):
      - double-buffered input tile  : 2 * Hp * in_itemsize
      - double-buffered output tile : 2 * Hp * out_itemsize
      - f32 temporaries (upcast, d) : ~3 * Hp * 4
    """
    in_b = jnp.dtype(in_dtype).itemsize
    out_b = jnp.dtype(out_dtype).itemsize
    per_row = Hp * (2 * in_b + 2 * out_b + 3 * 4)
    tile = vmem_budget_bytes // max(per_row, 1)
    # Cap at 8192 rows: even for tiny H this is multiple microseconds of HBM
    # traffic per grid step, so per-step overhead is fully amortized.
    tile = max(8, min(int(tile), 8192))
    tile = (tile // 8) * 8
    # Never much larger than the row count: one partial edge block suffices.
    tile = min(tile, ((R + 7) // 8) * 8)
    return max(tile, 8)


def layer_norm(x, weight, bias, eps=1e-5, row_tile=None):
    """x: any shape (..., H). weight/bias: (H,). Returns same shape/dtype as x."""
    orig_shape = x.shape
    H = orig_shape[-1]
    x2 = x.reshape(-1, H)
    R = x2.shape[0]

    # Lane-dense output: pad hidden to a multiple of 128 so stores are
    # unmasked vst. gamma/beta are padded with zeros so padded output columns
    # are exactly zero and sliced off below.
    Hp = ((H + 127) // 128) * 128
    if Hp != H:
        x2 = jnp.pad(x2, ((0, 0), (0, Hp - H)))
        w2 = jnp.pad(weight, (0, Hp - H)).reshape(1, Hp)
        b2 = jnp.pad(bias, (0, Hp - H)).reshape(1, Hp)
    else:
        w2 = weight.reshape(1, Hp)
        b2 = bias.reshape(1, Hp)

    vmem_budget, vmem_limit = _vmem_budget_and_limit()
    if row_tile is None:
        row_tile = _pick_row_tile(R, Hp, x.dtype, x.dtype, vmem_budget)

    grid = (pl.cdiv(R, row_tile),)  # masked edge block handles R % row_tile

    native_apply = x2.dtype == jnp.bfloat16   # bf16 VALU apply on v6e/v7x
    # TODO(synk): gate native_apply off on v5e (no bf16 VPU) once a stable
    # chip-generation query is exposed; harmless elsewhere (compiler upcasts).

    x_item = jnp.dtype(x.dtype).itemsize
    cost = pl.CostEstimate(
        flops=8 * R * H,
        transcendentals=R,  # one rsqrt per row
        bytes_accessed=(R * Hp * 2 * x_item
                        + Hp * (jnp.dtype(weight.dtype).itemsize
                                + jnp.dtype(bias.dtype).itemsize)),
    )

    out = pl.pallas_call(
        functools.partial(layernorm_kernel, eps=eps, hidden=H,
                          hidden_padded=Hp, native_apply=native_apply),
        out_shape=jax.ShapeDtypeStruct((R, Hp), x.dtype),
        grid_spec=pltpu.PrefetchScalarGridSpec(
            num_scalar_prefetch=0,
            grid=grid,
            in_specs=[
                pl.BlockSpec((row_tile, Hp), lambda i: (i, 0)),
                pl.BlockSpec((1, Hp), lambda i: (0, 0)),   # gamma (resident)
                pl.BlockSpec((1, Hp), lambda i: (0, 0)),   # beta  (resident)
            ],
            out_specs=pl.BlockSpec((row_tile, Hp), lambda i: (i, 0)),
        ),
        compiler_params=pltpu.CompilerParams(
            # "parallel" is a no-op on single-TC v5e/v6e and lets the runtime
            # shard the independent row axis across the two TCs on v7x.
            dimension_semantics=("parallel",),
            vmem_limit_bytes=vmem_limit,
        ),
        cost_estimate=cost,
    )(x2, w2, b2)

    if Hp != H:
        out = out[:, :H]
    return out.reshape(orig_shape)


def layer_norm_ref(x, weight, bias, eps=1e-5):
    u = jnp.mean(x, axis=-1, keepdims=True)
    s = jnp.mean((x - u) ** 2, axis=-1, keepdims=True)
    y = (x - u) / jnp.sqrt(s + eps)
    return weight * y + bias


if __name__ == "__main__":
    key = jax.random.PRNGKey(0)
    batch, seq, hidden = 2, 8, 32

    x = jax.random.normal(key, (batch, seq, hidden), dtype=jnp.float32)
    # Deterministic param init matching nn.Parameter(torch.ones/zeros(hidden)).
    weight = jnp.ones((hidden,), dtype=jnp.float32)
    bias = jnp.zeros((hidden,), dtype=jnp.float32)

    out = jax.block_until_ready(layer_norm(x, weight, bias, eps=1e-5))
    ref = layer_norm_ref(x, weight, bias, eps=1e-5)
    assert out.shape == x.shape and out.dtype == x.dtype
    assert jnp.allclose(out, ref, atol=1e-5, rtol=1e-5)

    # Edge case: row count not a multiple of 8 / the row tile — exercises the
    # masked partial row block.
    x_odd = jax.random.normal(jax.random.PRNGKey(1), (3, 5, hidden), dtype=jnp.float32)
    out_odd = jax.block_until_ready(layer_norm(x_odd, weight, bias, eps=1e-5))
    ref_odd = layer_norm_ref(x_odd, weight, bias, eps=1e-5)
    assert out_odd.shape == x_odd.shape
    assert jnp.allclose(out_odd, ref_odd, atol=1e-5, rtol=1e-5)

    # bf16 path: f32 statistics, native-dtype affine apply.
    xb = x.astype(jnp.bfloat16)
    out_b = jax.block_until_ready(layer_norm(xb, weight, bias, eps=1e-5))
    ref_b = layer_norm_ref(xb.astype(jnp.float32), weight, bias, eps=1e-5)
    assert out_b.shape == xb.shape and out_b.dtype == jnp.bfloat16
    assert jnp.allclose(out_b.astype(jnp.float32), ref_b, atol=1e-1, rtol=1e-1)

    print("KERNEL_OK")
</pallas_src>

<mosaic_0001>
module attributes {stable_mosaic.version = 11 : i64} {
  func.func @layernorm_kernel(%arg0: i32, %arg1: memref<16x128xf32, #tpu.memory_space<vmem>>, %arg2: memref<1x128xf32, #tpu.memory_space<vmem>>, %arg3: memref<1x128xf32, #tpu.memory_space<vmem>>, %arg4: memref<16x128xf32, #tpu.memory_space<vmem>>) attributes {dimension_semantics = [#tpu.dimension_semantics<parallel>], iteration_bounds = array<i64: 1>, scalar_prefetch = 0 : i64, scratch_operands = 0 : i64, tpu.core_type = #tpu.core_type<tc>, window_params = [{transform_indices = @transform_0, window_bounds = array<i64: 16, 128>}, {pipeline_mode = #tpu.pipeline_mode<synchronous>, transform_indices = @transform_1, window_bounds = array<i64: 1, 128>}, {pipeline_mode = #tpu.pipeline_mode<synchronous>, transform_indices = @transform_2, window_bounds = array<i64: 1, 128>}, {transform_indices = @transform_3, window_bounds = array<i64: 16, 128>}]} {
    %c0 = arith.constant 0 : index
    %c0_0 = arith.constant 0 : index
    %0 = vector.load %arg1[%c0, %c0_0] : memref<16x128xf32, #tpu.memory_space<vmem>>, vector<16x128xf32>
    %cst = arith.constant dense<0.000000e+00> : vector<16xf32>
    %1 = vector.multi_reduction <add>, %0, %cst [1] : vector<16x128xf32> to vector<16xf32>
    %2 = vector.shape_cast %1 : vector<16xf32> to vector<16x1xf32>
    %cst_1 = arith.constant 3.125000e-02 : f32
    %3 = vector.broadcast %cst_1 : f32 to vector<16x1xf32>
    %4 = arith.mulf %2, %3 : vector<16x1xf32>
    %5 = vector.broadcast %4 : vector<16x1xf32> to vector<16x128xf32>
    %6 = arith.subf %0, %5 : vector<16x128xf32>
    %7 = tpu.iota {dimensions = array<i32: 1>} : vector<16x128xi32>
    %c32_i32 = arith.constant 32 : i32
    %8 = vector.broadcast %c32_i32 : i32 to vector<16x128xi32>
    %9 = arith.cmpi slt, %7, %8 : vector<16x128xi32>
    %cst_2 = arith.constant 0.000000e+00 : f32
    %10 = vector.broadcast %cst_2 : f32 to vector<16x128xf32>
    %11 = arith.select %9, %6, %10 : vector<16x128xi1>, vector<16x128xf32>
    %12 = arith.mulf %11, %11 : vector<16x128xf32>
    %cst_3 = arith.constant dense<0.000000e+00> : vector<16xf32>
    %13 = vector.multi_reduction <add>, %12, %cst_3 [1] : vector<16x128xf32> to vector<16xf32>
    %14 = vector.shape_cast %13 : vector<16xf32> to vector<16x1xf32>
    %cst_4 = arith.constant 3.125000e-02 : f32
    %15 = vector.broadcast %cst_4 : f32 to vector<16x1xf32>
    %16 = arith.mulf %14, %15 : vector<16x1xf32>
    %cst_5 = arith.constant 9.99999974E-6 : f32
    %17 = vector.broadcast %cst_5 : f32 to vector<16x1xf32>
    %18 = arith.addf %16, %17 : vector<16x1xf32>
    %19 = math.rsqrt %18 : vector<16x1xf32>
    %20 = vector.broadcast %19 : vector<16x1xf32> to vector<16x128xf32>
    %21 = arith.mulf %11, %20 : vector<16x128xf32>
    %c0_6 = arith.constant 0 : index
    %c0_7 = arith.constant 0 : index
    %22 = vector.load %arg2[%c0_6, %c0_7] : memref<1x128xf32, #tpu.memory_space<vmem>>, vector<1x128xf32>
    %23 = vector.broadcast %22 : vector<1x128xf32> to vector<16x128xf32>
    %24 = arith.mulf %23, %21 : vector<16x128xf32>
    %c0_8 = arith.constant 0 : index
    %c0_9 = arith.constant 0 : index
    %25 = vector.load %arg3[%c0_8, %c0_9] : memref<1x128xf32, #tpu.memory_space<vmem>>, vector<1x128xf32>
    %26 = vector.broadcast %25 : vector<1x128xf32> to vector<16x128xf32>
    %27 = arith.addf %24, %26 : vector<16x128xf32>
    %c0_10 = arith.constant 0 : index
    %c0_11 = arith.constant 0 : index
    %28 = vector.load %arg4[%c0_10, %c0_11] : memref<16x128xf32, #tpu.memory_space<vmem>>, vector<16x128xf32>
    tpu.vector_store %arg4[%c0_10, %c0_11], %27 {strides = array<i32>} : memref<16x128xf32, #tpu.memory_space<vmem>>, vector<16x128xf32>,
    return
  }
  func.func @transform_0(%arg0: i32) -> (i32, i32) {
    %c0_i32 = arith.constant 0 : i32
    %c0_i32_0 = arith.constant 0 : i32
    return %arg0, %c0_i32 : i32, i32
  }
  func.func @transform_1(%arg0: i32) -> (i32, i32) {
    %c0_i32 = arith.constant 0 : i32
    %c0_i32_0 = arith.constant 0 : i32
    %c0_i32_1 = arith.constant 0 : i32
    return %c0_i32, %c0_i32_0 : i32, i32
  }
  func.func @transform_2(%arg0: i32) -> (i32, i32) {
    %c0_i32 = arith.constant 0 : i32
    %c0_i32_0 = arith.constant 0 : i32
    %c0_i32_1 = arith.constant 0 : i32
    return %c0_i32, %c0_i32_0 : i32, i32
  }
  func.func @transform_3(%arg0: i32) -> (i32, i32) {
    %c0_i32 = arith.constant 0 : i32
    %c0_i32_0 = arith.constant 0 : i32
    return %arg0, %c0_i32 : i32, i32
  }
}

</mosaic_0001>

<bundles_post_ra>
// kernel: tpu_custom_call.1
= control target key start
LH: loop header
LB: loop body
LE: loop exit
PB: predicated region body
PF: predicated region fallthrough
CT: control target
= control target key end

     0   :  { %8 = vsyncpa [#allocation3], 0  ;;  %s191_s0 = inlined_call_operand.hbm [shape: f32[16,128], index: 0, kind: input, shape index: {}]   ;;  %s192_s1 = inlined_call_operand.vmem [shape: f32[1,128], index: 1, kind: input, shape index: {}]   ;;  %s193_s2 = inlined_call_operand.vmem [shape: f32[1,128], index: 2, kind: input, shape index: {}]   ;;  %s194_s3 = inlined_call_operand.hbm [shape: f32[16,128], index: 3, kind: output, shape index: {}]  }
   0x1   :  { %9 = vsyncpa [#allocation4], 0  ;;  %s149_s12 = smov [#allocation2]  }
   0x2   :  { %s15_s13 = sshll.u32 %s149_s12, 4  ;;  %s16_s13 = int_to_ptr.vmem [resolvable:$true] %s15_s13 }
   0x3   :  { %s113_s14 = scalar_lea.vmem %s16_s13, 256  ;;  %p118_p1 = scmp.lt.s32.totalorder %s16_s13, %s16_s13 }
   0x4   :  { %p114_p0 = scmp.ne.s32.totalorder %s16_s13, %s113_s14  ;;  %p119_p2 = scmp.lt.s32.totalorder %s113_s14, %s113_s14 }
   0x6   :  { %p120_p3 = por %p119_p2, %p118_p1 }
   0x8   :  { %p121_p4 = pnand %p120_p3, %p114_p0 }
   0xa   :  { %124 = shalt.err (!%p121_p4)
}
   0xb   :  { %s150_s15 = smov 128   ;;  %s151_s16 = smov 8  }
   0xc   :  { %21 = dma.hbm_to_vmem [thread:$0]  %s191_s0, 256, %s16_s13, [#allocation3], %s150_s15, %s150_s15, %s151_s16  }
   0xd   :  { %145 = dma.done.wait [#allocation3], 256  }
   0xe   :  { %146 = vsyncadd [#allocation3], 4294967040  ;;  %v29_v0 = vld [vmem:[#allocation2] sm:$0xff]  ;;  %v30_v1 = vld [vmem:[#allocation2 + $0x8] sm:$0xff]  ;;  %v39_v2 = vlaneseq  ;;  %s152_s22 = smov [#allocation5]  }
   0xf   :  { %31 = vadd.xlane.f32.xlu0 %v29_v0  ;;  %v95_v21 = vld [vmem:[%s192_s1] ss:$0 sm:$0xff]  ;;  %s83_s23 = sshll.u32 %s152_s22, 4  ;;  %s84_s23 = int_to_ptr.vmem [resolvable:$true] %s83_s23 }
  0x10   :  { %v40_v3 = vand.u32 127, %v39_v2  ;;  %v96_v23 = vld [vmem:[%s193_s2] ss:$0 sm:$0xff]  ;;  %s125_s24 = scalar_lea.vmem %s84_s23, 256  ;;  %p130_p6 = scmp.lt.s32.totalorder %s84_s23, %s84_s23 }
  0x11   :  { %p126_p5 = scmp.ne.s32.totalorder %s84_s23, %s125_s24  ;;  %p131_p7 = scmp.lt.s32.totalorder %s125_s24, %s125_s24 }
  0x12   :  { %vm41_vm0 = vcmp.lt.s32.totalorder %v40_v3, 32 }
  0x13   :  { %33 = vadd.xlane.f32.xlu0 %v30_v1  ;;  %p132_p8 = por %p131_p7, %p130_p6 }
  0x15   :  { %p133_p9 = pnand %p132_p8, %p126_p5 }
  0x98   :  { %v32_v4 = vpop.xlane.xlu0 %31 }
  0x99   :  { %v35_v5 = vmul.f32 0.03125, %v32_v4 }
  0x9b   :  { %v37_v6 = vsub.f32 %v29_v0, %v35_v5 }
  0x9c   :  { %v34_v7 = vpop.xlane.xlu0 %33 }
  0x9d   :  { %v36_v8 = vmul.f32 0.03125, %v34_v7  ;;  %v42_v9 = vsel %vm41_vm0, %v37_v6, 0.0 }
  0x9e   :  { %v44_v10 = vmul.f32 %v42_v9, %v42_v9 }
  0x9f   :  { %v38_v11 = vsub.f32 %v30_v1, %v36_v8 }
  0xa0   :  { %46 = vadd.xlane.f32.xlu1 %v44_v10 }
  0xa1   :  { %v43_v12 = vsel %vm41_vm0, %v38_v11, 0.0 }
  0xa2   :  { %v45_v13 = vmul.f32 %v43_v12, %v43_v12 }
  0xa4   :  { %48 = vadd.xlane.f32.xlu1 %v45_v13 }
 0x129   :  { %v47_v14 = vpop.xlane.xlu1 %46 }
 0x12a   :  { %v50_v15 = vmul.f32 0.03125, %v47_v14 }
 0x12c   :  { %v52_v16 = vadd.f32 1e-05, %v50_v15 }
 0x12d   :  { %v49_v17 = vpop.xlane.xlu1 %48 }
 0x12e   :  { %101 = vrsqrt.f32 %v52_v16  ;;  %v51_v18 = vmul.f32 0.03125, %v49_v17 }
 0x130   :  { %v53_v19 = vadd.f32 1e-05, %v51_v18 }
 0x132   :  { %103 = vrsqrt.f32 %v53_v19 }
 0x13b   :  { %v102_v20 = vpop.eup %101 }
 0x13c   :  { %v56_v22 = vmul.f32 %v102_v20, %v42_v9 }
 0x13e   :  { %v65_v24 = vmul.f32 %v95_v21, %v56_v22 }
 0x13f   :  { %v104_v25 = vpop.eup %103 }
 0x140   :  { %v57_v26 = vmul.f32 %v104_v25, %v43_v12  ;;  %v74_v27 = vadd.f32 %v96_v23, %v65_v24 }
 0x142   :  { %v66_v28 = vmul.f32 %v95_v21, %v57_v26  ;;  %76 = vst [vmem:[#allocation5] sm:$0xff] %v74_v27 }
 0x144   :  { %v75_v29 = vadd.f32 %v96_v23, %v66_v28 }
 0x146   :  { %77 = vst [vmem:[#allocation5 + $0x8] sm:$0xff] %v75_v29 }
 0x147   :  { %136 = shalt.err (!%p133_p9)
}
 0x148   :  { %89 = dma.vmem_to_hbm [thread:$0]  %s84_s23, 256, %s194_s3, [#allocation4], %s150_s15, %s150_s15, %s151_s16  }
 0x149   :  { %147 = dma.done.wait [#allocation4], 256  }
 0x14a   :  { %148 = vsyncadd [#allocation4], 4294967040 }
 0x14b   :  { %93 = vsyncpa [#allocation3], 1 }
 0x14c   :  { %94 = vsyncpa [#allocation4], 1 }

</bundles_post_ra>
